<compile_context>
chip_gen: v7x
topology: tpu7x:2x2x1
jax: 0.10.0
libtpu: 0.0.40
codegen_flags: <defaults>
</compile_context>

<pallas_src>
import functools

import jax
import jax.numpy as jnp
import numpy as np
from jax import lax
from jax.experimental import pallas as pl
from jax.experimental.pallas import tpu as pltpu

BN_EPS = 1e-5
LEAKY_SLOPE = 0.01  # torch.nn.LeakyReLU default
LANE = 128


def _round_up(x, m):
    return (x + m - 1) // m * m


def _conv_stats_kernel(patches_ref, w_ref, conv_ref, stats_ref):
    """Per tile: one (TP,9C)@(9C,CP) MXU matmul, bf16 conv tile + f32 partial stats.

    patches_ref: (TP, 9*C) bf16  im2col tile (taps folded into the contraction dim)
    w_ref:       (9*C, CP) bf16  weights, output channels zero-padded to CP
    conv_ref:    (TP, CP)  bf16  conv output tile (lane-dense)
    stats_ref:   (2, CP)   f32   per-tile [sum; sum_sq] partials (reduced in XLA glue)
    """
    a = jnp.dot(patches_ref[...], w_ref[...], preferred_element_type=jnp.float32)
    # Stats from the f32 accumulator *before* the bf16 downcast, so BatchNorm statistics
    # do not pick up quantization bias.
    stats_ref[0:1, :] = jnp.sum(a, axis=0, keepdims=True)
    stats_ref[1:2, :] = jnp.sum(a * a, axis=0, keepdims=True)
    conv_ref[...] = a.astype(conv_ref.dtype)


def _bn_act_kernel(conv_ref, scale_ref, shift_ref, out_ref):
    """Per tile: folded BatchNorm affine + LeakyReLU, stored transposed (NCHW layout)."""
    y = conv_ref[...].astype(jnp.float32) * scale_ref[...] + shift_ref[...]
    y = jnp.where(y >= 0, y, LEAKY_SLOPE * y)
    # (TP, CP) -> (CP, TP): rides the otherwise idle XLU in this mem-bound pass; the lane
    # dim TP is a multiple of 128 so the store stays lane-dense (unmasked vst).
    out_ref[...] = jnp.transpose(y, (1, 0)).astype(out_ref.dtype)


@functools.partial(jax.jit, static_argnames=("tile_p",))
def downsample(x_nchw, weight, gamma, beta, *, tile_p=512):
    """x_nchw: (N, C, H, W)  weight: (C, C, 3, 3)  gamma/beta: (C,). Returns NCHW."""
    n, c, h, w = x_nchw.shape
    ho = (h + 2 - 3) // 2 + 1
    wo = (w + 2 - 3) // 2 + 1
    p_img = ho * wo                 # real output pixels per image
    p = n * p_img                   # real output pixels total (for BN stats)

    # NCHW-layout output blocks need tile_p to be a multiple of 128 (lane dim of the
    # transposed store); clamp to the (rounded) per-image spatial extent for tiny images.
    tile_p = max(LANE, (tile_p // LANE) * LANE)
    tile_p = min(tile_p, _round_up(p_img, LANE))
    pp_img = _round_up(p_img, tile_p)   # per-image padded pixel count
    tiles_per_img = pp_img // tile_p
    cp = _round_up(c, LANE)             # lane-dense channel dim

    # ---- XLA glue: NCHW -> NHWC (bf16), reflect pad, im2col with taps folded into K ----
    x = jnp.transpose(x_nchw, (0, 2, 3, 1)).astype(jnp.bfloat16)
    xpad = jnp.pad(x, ((0, 0), (1, 1), (1, 1), (0, 0)), mode="reflect")
    pats = [
        xpad[:, kh:kh + 2 * ho:2, kw:kw + 2 * wo:2, :]
        for kh in range(3)
        for kw in range(3)
    ]
    patches = jnp.concatenate(pats, axis=-1).reshape(n, p_img, 9 * c)
    # Zero-pad the per-image pixel dim: padded rows contribute 0 to sum and sum_sq, so
    # dividing the reduced stats by the *real* P keeps BatchNorm exact.
    patches = jnp.pad(patches, ((0, 0), (0, pp_img - p_img), (0, 0)))

    # (Cout, Cin, kh, kw) -> (kh, kw, Cin, Cout) -> (9*Cin, Cout), pad Cout to CP.
    wk = jnp.transpose(weight.astype(jnp.bfloat16), (2, 3, 1, 0)).reshape(9 * c, c)
    wk = jnp.pad(wk, ((0, 0), (0, cp - c)))

    grid = (n, tiles_per_img)

    # ---- pass 1: conv tiles (bf16) + per-tile per-channel partial sum / sum-of-squares ----
    conv3, stats = pl.pallas_call(
        _conv_stats_kernel,
        out_shape=(
            jax.ShapeDtypeStruct((n, pp_img, cp), jnp.bfloat16),
            jax.ShapeDtypeStruct((n, tiles_per_img, 2, cp), jnp.float32),
        ),
        grid_spec=pltpu.PrefetchScalarGridSpec(
            num_scalar_prefetch=0,
            grid=grid,
            in_specs=[
                pl.BlockSpec((None, tile_p, 9 * c), lambda b, t: (b, t, 0)),
                pl.BlockSpec((9 * c, cp), lambda b, t: (0, 0)),
            ],
            out_specs=(
                pl.BlockSpec((None, tile_p, cp), lambda b, t: (b, t, 0)),
                pl.BlockSpec((None, None, 2, cp), lambda b, t: (b, t, 0, 0)),
            ),
        ),
        compiler_params=pltpu.CompilerParams(
            # Per-tile partial stats -> no cross-iteration dependency -> fully parallel
            # (both v7x TensorCores get work).
            dimension_semantics=("parallel", "parallel"),
            vmem_limit_bytes=32 * 1024 * 1024,
        ),
        cost_estimate=pl.CostEstimate(
            flops=2 * n * pp_img * 9 * c * cp,
            transcendentals=0,
            bytes_accessed=(n * pp_img * 9 * c * 2 + 9 * c * cp * 2
                            + n * pp_img * cp * 2 + n * tiles_per_img * 2 * cp * 4),
        ),
    )(patches, wk)

    # ---- tiny glue: reduce partial stats, fold batch stats + gamma/beta into scale/shift ----
    ssum = jnp.sum(stats, axis=(0, 1))                      # (2, cp)
    mean = ssum[0] / p                                      # real P, not padded
    var = jnp.maximum(ssum[1] / p - mean * mean, 0.0)       # biased variance (PyTorch BN)
    gamma_p = jnp.pad(gamma.astype(jnp.float32), (0, cp - c))
    beta_p = jnp.pad(beta.astype(jnp.float32), (0, cp - c))
    inv = lax.rsqrt(var + BN_EPS)
    scale = (gamma_p * inv).reshape(1, cp)
    shift = (beta_p - mean * gamma_p * inv).reshape(1, cp)

    # ---- pass 2: normalize + LeakyReLU, NCHW-layout output, fully parallel ----
    out3 = pl.pallas_call(
        _bn_act_kernel,
        out_shape=jax.ShapeDtypeStruct((n, cp, pp_img), jnp.float32),
        grid_spec=pltpu.PrefetchScalarGridSpec(
            num_scalar_prefetch=0,
            grid=grid,
            in_specs=[
                pl.BlockSpec((None, tile_p, cp), lambda b, t: (b, t, 0)),
                pl.BlockSpec((1, cp), lambda b, t: (0, 0)),
                pl.BlockSpec((1, cp), lambda b, t: (0, 0)),
            ],
            out_specs=pl.BlockSpec((None, cp, tile_p), lambda b, t: (b, 0, t)),
        ),
        compiler_params=pltpu.CompilerParams(
            dimension_semantics=("parallel", "parallel"),
            vmem_limit_bytes=32 * 1024 * 1024,
        ),
        cost_estimate=pl.CostEstimate(
            flops=4 * n * pp_img * cp,
            transcendentals=0,
            bytes_accessed=n * pp_img * cp * (2 + 4) + 2 * cp * 4,
        ),
    )(conv3, scale, shift)

    # Strip channel / pixel padding. Output is already NCHW, so no transpose round trip.
    return out3[:, :c, :p_img].reshape(n, c, ho, wo)


def _reference(x_nchw, weight, gamma, beta):
    """Pure-JAX f32 reference of the same forward pass (sanity check)."""
    x = jnp.transpose(x_nchw, (0, 2, 3, 1)).astype(jnp.float32)
    xpad = jnp.pad(x, ((0, 0), (1, 1), (1, 1), (0, 0)), mode="reflect")
    w_hwio = jnp.transpose(weight.astype(jnp.float32), (2, 3, 1, 0))  # (kh,kw,Cin,Cout)
    conv = lax.conv_general_dilated(
        xpad, w_hwio, window_strides=(2, 2), padding="VALID",
        dimension_numbers=("NHWC", "HWIO", "NHWC"))
    mean = jnp.mean(conv, axis=(0, 1, 2), keepdims=True)
    var = jnp.mean((conv - mean) ** 2, axis=(0, 1, 2), keepdims=True)
    y = (conv - mean) * (gamma.reshape(1, 1, 1, -1) * lax.rsqrt(var + BN_EPS))
    y = y + beta.reshape(1, 1, 1, -1)
    y = jnp.where(y >= 0, y, LEAKY_SLOPE * y)
    return jnp.transpose(y, (0, 3, 1, 2))


if __name__ == "__main__":
    N, C, H, W = 2, 4, 16, 16
    key = jax.random.PRNGKey(0)
    k_x, k_w = jax.random.split(key)

    x = jax.random.normal(k_x, (N, C, H, W), dtype=jnp.float32)
    # Conv2d(channel, channel, 3) weight: (C_out, C_in, 3, 3), no bias.
    fan_in = C * 3 * 3
    weight = jax.random.normal(k_w, (C, C, 3, 3), dtype=jnp.float32) / jnp.sqrt(fan_in)
    # BatchNorm2d default init: gamma=1, beta=0.
    gamma = jnp.ones((C,), dtype=jnp.float32)
    beta = jnp.zeros((C,), dtype=jnp.float32)

    # n=2 images -> 2 grid tiles, exercising the multi-tile partial-stats reduction path.
    out = jax.block_until_ready(downsample(x, weight, gamma, beta))
    assert out.shape == (N, C, H // 2, W // 2), out.shape

    ref = jax.block_until_ready(_reference(x, weight, gamma, beta))
    # bf16 inputs/weights/intermediate vs f32 reference -> loosened tolerance
    # (matmul accumulation and BN statistics remain f32).
    np.testing.assert_allclose(np.asarray(out), np.asarray(ref), rtol=5e-2, atol=5e-2)

    print("KERNEL_OK")
</pallas_src>

<mosaic_0001>
module attributes {stable_mosaic.version = 11 : i64} {
  func.func @_conv_stats_kernel(%arg0: i32, %arg1: i32, %arg2: memref<1x128x36xbf16, #tpu.memory_space<vmem>>, %arg3: memref<36x128xbf16, #tpu.memory_space<vmem>>, %arg4: memref<1x128x128xbf16, #tpu.memory_space<vmem>>, %arg5: memref<1x1x2x128xf32, #tpu.memory_space<vmem>>) attributes {dimension_semantics = [#tpu.dimension_semantics<parallel>, #tpu.dimension_semantics<parallel>], iteration_bounds = array<i64: 2, 1>, scalar_prefetch = 0 : i64, scratch_operands = 0 : i64, tpu.core_type = #tpu.core_type<tc>, window_params = [{transform_indices = @transform_0, window_bounds = array<i64: 1, 128, 36>}, {pipeline_mode = #tpu.pipeline_mode<synchronous>, transform_indices = @transform_1, window_bounds = array<i64: 36, 128>}, {transform_indices = @transform_2, window_bounds = array<i64: 1, 128, 128>}, {transform_indices = @transform_3, window_bounds = array<i64: 1, 1, 2, 128>}]} {
    %c0 = arith.constant 0 : index
    %c0_0 = arith.constant 0 : index
    %c0_1 = arith.constant 0 : index
    %0 = vector.load %arg2[%c0, %c0_0, %c0_1] : memref<1x128x36xbf16, #tpu.memory_space<vmem>>, vector<1x128x36xbf16>
    %1 = vector.shape_cast %0 : vector<1x128x36xbf16> to vector<128x36xbf16>
    %c0_2 = arith.constant 0 : index
    %c0_3 = arith.constant 0 : index
    %2 = vector.load %arg3[%c0_2, %c0_3] : memref<36x128xbf16, #tpu.memory_space<vmem>>, vector<36x128xbf16>
    %cst = arith.constant dense<0.000000e+00> : vector<128x128xf32>
    %3 = tpu.matmul %1, %2, %cst {dimension_numbers = #tpu.dot_dimension_numbers<[1], [0], [0], [1], [0, 0, 1, 1], [], []>} : vector<128x36xbf16>, vector<36x128xbf16>, vector<128x128xf32> -> vector<128x128xf32>
    %cst_4 = arith.constant dense<0.000000e+00> : vector<128xf32>
    %4 = vector.multi_reduction <add>, %3, %cst_4 [0] : vector<128x128xf32> to vector<128xf32>
    %5 = vector.shape_cast %4 : vector<128xf32> to vector<1x128xf32>
    %c0_5 = arith.constant 0 : index
    %c0_6 = arith.constant 0 : index
    %c0_7 = arith.constant 0 : index
    %c0_8 = arith.constant 0 : index
    %6 = vector.load %arg5[%c0_5, %c0_6, %c0_7, %c0_8] : memref<1x1x2x128xf32, #tpu.memory_space<vmem>>, vector<1x1x1x128xf32>
    %7 = vector.shape_cast %6 : vector<1x1x1x128xf32> to vector<1x128xf32>
    %8 = vector.shape_cast %5 : vector<1x128xf32> to vector<1x1x1x128xf32>
    tpu.vector_store %arg5[%c0_5, %c0_6, %c0_7, %c0_8], %8 {strides = array<i32>} : memref<1x1x2x128xf32, #tpu.memory_space<vmem>>, vector<1x1x1x128xf32>,
    %9 = arith.mulf %3, %3 : vector<128x128xf32>
    %cst_9 = arith.constant dense<0.000000e+00> : vector<128xf32>
    %10 = vector.multi_reduction <add>, %9, %cst_9 [0] : vector<128x128xf32> to vector<128xf32>
    %11 = vector.shape_cast %10 : vector<128xf32> to vector<1x128xf32>
    %c0_10 = arith.constant 0 : index
    %c0_11 = arith.constant 0 : index
    %c1 = arith.constant 1 : index
    %c0_12 = arith.constant 0 : index
    %12 = vector.load %arg5[%c0_10, %c0_11, %c1, %c0_12] : memref<1x1x2x128xf32, #tpu.memory_space<vmem>>, vector<1x1x1x128xf32>
    %13 = vector.shape_cast %12 : vector<1x1x1x128xf32> to vector<1x128xf32>
    %14 = vector.shape_cast %11 : vector<1x128xf32> to vector<1x1x1x128xf32>
    tpu.vector_store %arg5[%c0_10, %c0_11, %c1, %c0_12], %14 {strides = array<i32>} : memref<1x1x2x128xf32, #tpu.memory_space<vmem>>, vector<1x1x1x128xf32>,
    %15 = arith.truncf %3 : vector<128x128xf32> to vector<128x128xbf16>
    %c0_13 = arith.constant 0 : index
    %c0_14 = arith.constant 0 : index
    %c0_15 = arith.constant 0 : index
    %16 = vector.load %arg4[%c0_13, %c0_14, %c0_15] : memref<1x128x128xbf16, #tpu.memory_space<vmem>>, vector<1x128x128xbf16>
    %17 = vector.shape_cast %16 : vector<1x128x128xbf16> to vector<128x128xbf16>
    %18 = vector.shape_cast %15 : vector<128x128xbf16> to vector<1x128x128xbf16>
    tpu.vector_store %arg4[%c0_13, %c0_14, %c0_15], %18 {strides = array<i32>} : memref<1x128x128xbf16, #tpu.memory_space<vmem>>, vector<1x128x128xbf16>,
    return
  }
  func.func @transform_0(%arg0: i32, %arg1: i32) -> (i32, i32, i32) {
    %c0_i32 = arith.constant 0 : i32
    %c0_i32_0 = arith.constant 0 : i32
    return %arg0, %arg1, %c0_i32 : i32, i32, i32
  }
  func.func @transform_1(%arg0: i32, %arg1: i32) -> (i32, i32) {
    %c0_i32 = arith.constant 0 : i32
    %c0_i32_0 = arith.constant 0 : i32
    %c0_i32_1 = arith.constant 0 : i32
    return %c0_i32, %c0_i32_0 : i32, i32
  }
  func.func @transform_2(%arg0: i32, %arg1: i32) -> (i32, i32, i32) {
    %c0_i32 = arith.constant 0 : i32
    %c0_i32_0 = arith.constant 0 : i32
    return %arg0, %arg1, %c0_i32 : i32, i32, i32
  }
  func.func @transform_3(%arg0: i32, %arg1: i32) -> (i32, i32, i32, i32) {
    %c0_i32 = arith.constant 0 : i32
    %c0_i32_0 = arith.constant 0 : i32
    %c0_i32_1 = arith.constant 0 : i32
    return %arg0, %arg1, %c0_i32, %c0_i32_0 : i32, i32, i32, i32
  }
}

module attributes {stable_mosaic.version = 11 : i64} {
  func.func @_bn_act_kernel(%arg0: i32, %arg1: i32, %arg2: memref<1x128x128xbf16, #tpu.memory_space<vmem>>, %arg3: memref<1x128xf32, #tpu.memory_space<vmem>>, %arg4: memref<1x128xf32, #tpu.memory_space<vmem>>, %arg5: memref<1x128x128xf32, #tpu.memory_space<vmem>>) attributes {dimension_semantics = [#tpu.dimension_semantics<parallel>, #tpu.dimension_semantics<parallel>], iteration_bounds = array<i64: 2, 1>, scalar_prefetch = 0 : i64, scratch_operands = 0 : i64, tpu.core_type = #tpu.core_type<tc>, window_params = [{transform_indices = @transform_0, window_bounds = array<i64: 1, 128, 128>}, {pipeline_mode = #tpu.pipeline_mode<synchronous>, transform_indices = @transform_1, window_bounds = array<i64: 1, 128>}, {pipeline_mode = #tpu.pipeline_mode<synchronous>, transform_indices = @transform_2, window_bounds = array<i64: 1, 128>}, {transform_indices = @transform_3, window_bounds = array<i64: 1, 128, 128>}]} {
    %c0 = arith.constant 0 : index
    %c0_0 = arith.constant 0 : index
    %c0_1 = arith.constant 0 : index
    %0 = vector.load %arg2[%c0, %c0_0, %c0_1] : memref<1x128x128xbf16, #tpu.memory_space<vmem>>, vector<1x128x128xbf16>
    %1 = vector.shape_cast %0 : vector<1x128x128xbf16> to vector<128x128xbf16>
    %2 = arith.extf %1 : vector<128x128xbf16> to vector<128x128xf32>
    %c0_2 = arith.constant 0 : index
    %c0_3 = arith.constant 0 : index
    %3 = vector.load %arg3[%c0_2, %c0_3] : memref<1x128xf32, #tpu.memory_space<vmem>>, vector<1x128xf32>
    %4 = vector.broadcast %3 : vector<1x128xf32> to vector<128x128xf32>
    %5 = arith.mulf %2, %4 : vector<128x128xf32>
    %c0_4 = arith.constant 0 : index
    %c0_5 = arith.constant 0 : index
    %6 = vector.load %arg4[%c0_4, %c0_5] : memref<1x128xf32, #tpu.memory_space<vmem>>, vector<1x128xf32>
    %7 = vector.broadcast %6 : vector<1x128xf32> to vector<128x128xf32>
    %8 = arith.addf %5, %7 : vector<128x128xf32>
    %cst = arith.constant 0.000000e+00 : f32
    %9 = vector.broadcast %cst : f32 to vector<128x128xf32>
    %10 = arith.cmpf oge, %8, %9 : vector<128x128xf32>
    %cst_6 = arith.constant 0.00999999977 : f32
    %11 = vector.broadcast %cst_6 : f32 to vector<128x128xf32>
    %12 = arith.mulf %11, %8 : vector<128x128xf32>
    %13 = arith.select %10, %8, %12 : vector<128x128xi1>, vector<128x128xf32>
    %14 = tpu.transpose %13, [1, 0] : vector<128x128xf32> -> vector<128x128xf32>
    %c0_7 = arith.constant 0 : index
    %c0_8 = arith.constant 0 : index
    %c0_9 = arith.constant 0 : index
    %15 = vector.load %arg5[%c0_7, %c0_8, %c0_9] : memref<1x128x128xf32, #tpu.memory_space<vmem>>, vector<1x128x128xf32>
    %16 = vector.shape_cast %15 : vector<1x128x128xf32> to vector<128x128xf32>
    %17 = vector.shape_cast %14 : vector<128x128xf32> to vector<1x128x128xf32>
    tpu.vector_store %arg5[%c0_7, %c0_8, %c0_9], %17 {strides = array<i32>} : memref<1x128x128xf32, #tpu.memory_space<vmem>>, vector<1x128x128xf32>,
    return
  }
  func.func @transform_0(%arg0: i32, %arg1: i32) -> (i32, i32, i32) {
    %c0_i32 = arith.constant 0 : i32
    %c0_i32_0 = arith.constant 0 : i32
    return %arg0, %arg1, %c0_i32 : i32, i32, i32
  }
  func.func @transform_1(%arg0: i32, %arg1: i32) -> (i32, i32) {
    %c0_i32 = arith.constant 0 : i32
    %c0_i32_0 = arith.constant 0 : i32
    %c0_i32_1 = arith.constant 0 : i32
    return %c0_i32, %c0_i32_0 : i32, i32
  }
  func.func @transform_2(%arg0: i32, %arg1: i32) -> (i32, i32) {
    %c0_i32 = arith.constant 0 : i32
    %c0_i32_0 = arith.constant 0 : i32
    %c0_i32_1 = arith.constant 0 : i32
    return %c0_i32, %c0_i32_0 : i32, i32
  }
  func.func @transform_3(%arg0: i32, %arg1: i32) -> (i32, i32, i32) {
    %c0_i32 = arith.constant 0 : i32
    %c0_i32_0 = arith.constant 0 : i32
    return %arg0, %c0_i32, %arg1 : i32, i32, i32
  }
}

</mosaic_0001>

<bundles_post_ra>
// kernel: downsample.2
= control target key start
LH: loop header
LB: loop body
LE: loop exit
PB: predicated region body
PF: predicated region fallthrough
CT: control target
= control target key end

     0   :  { %s932_s12 = smov 0   ;;  %s934_s13 = smov 0   ;;  %s1003_s0 = inlined_call_operand.vmem [shape: bf16[2,128,36], index: 0, kind: input, shape index: {}]   ;;  %s1004_s1 = inlined_call_operand.vmem [shape: bf16[36,128], index: 1, kind: input, shape index: {}]   ;;  %s1005_s2 = inlined_call_operand.vmem [shape: bf16[2,128,128], index: 2, kind: output, shape index: {0}]   ;;  %s1006_s3 = inlined_call_operand.vmem [shape: f32[2,1,2,128], index: 3, kind: output, shape index: {1}]  }
   0x1   :  { %s936_s14 = smov 0  }
   0x2 LB: > { %s26_s15 = sadd.s32 1, %s906_s13  ;;  %p704_p0 = scmp.ge.s32.totalorder %s910_s14, 1  ;;  %s910_s14 = sphi %s936_s14, %s14_s14   ;;  %s906_s13 = sphi %s934_s13, %s1008_s13   ;;  %s902_s12 = sphi %s932_s12, %s1007_s12  }
   0x3   : > { %p28_p1 = scmp.ge.s32.totalorder %s26_s15, 2  ;;  %p163_p2 = scmp.lt.s32.totalorder %s910_s14, 3 }
   0x5   : > { %s1010_s15 = smov (%p28_p1, %s26_s15), 0  ;;  %p164_p3 = pnand %p704_p0, %p163_p2 }
   0x6   : > { %v877_v0 = vld [vmem:[%s1004_s1] sm:$0xff] (!%p164_p3)   ;;  %v878_v1 = vld [vmem:[%s1004_s1 + $0x8] sm:$0xff] (!%p164_p3)   ;;  %p203_p4 = scmp.lt.s32.totalorder (!%p164_p3), %s902_s12, 1  ;;  %v879_v2 = vld [vmem:[%s1004_s1 + $0x10] ss:$0 sps:$4 sm:$0x33] (!%p164_p3)  }
   0x7   : > { %167 = sbr.rel (%p164_p3) target bundleno = 279 (0x117), region = 28  ;;  %823 = vmatprep.subr.bf16.mxu0 (!%p164_p3), %v877_v0  ;;  %845 = vmatprep.subr.bf16.mxu1 (!%p164_p3), %v877_v0  ;;  %vm331_vm0 = vcmask (!%p164_p3), 1041408   ;;  %vm306_vm1 = vcmask (!%p164_p3), 293888  }
   0x8   : > { %824 = vmatpush3.bf16.msra.mxu0 (!%p164_p3), %v877_v0  ;;  %848 = vmatpush3.bf16.msra.mxu1 (!%p164_p3), %v877_v0  ;;  %v333_v4 = vsel (!%p164_p3), %vm331_vm0, %v879_v2, 0 }
   0x9   : > { %825 = vmatprep.subr.bf16.mxu0 (!%p164_p3), %v878_v1  ;;  %846 = vmatprep.subr.bf16.mxu1 (!%p164_p3), %v878_v1 }
   0xc   : > { %826 = vmatpush3.bf16.msra.mxu0 (!%p164_p3), %v878_v1  ;;  %849 = vmatpush3.bf16.msra.mxu1 (!%p164_p3), %v878_v1 }
   0xd   : > { %851 = vmatprep.subr.msk.bf16.mxu0 (!%p164_p3), %vm331_vm0, %v879_v2  ;;  %852 = vmatprep.subr.msk.bf16.mxu1 (!%p164_p3), %vm331_vm0, %v879_v2 }
   0xe   : > { %s1012_s12 = smov (!%p203_p4, %s902_s12), 1 }
   0xf   : > { %s747_s22 = sshll.u32 %s1012_s12, 6  ;;  %s709_s29 = sshll.u32 %s1012_s12, 1 }
  0x10   : > { %s210_s25 = scalar_lea.vmem %s1003_s0, %s747_s22  ;;  %828 = vmatpush3.bf16.msra.mxu0 %v333_v4  ;;  %850 = vmatpush3.bf16.msra.mxu1 %v333_v4  ;;  %s980_s28 = scalar_lea.vmem %s1005_s2, %s747_s22 }
  0x11   : > { %v880_v3 = vld [vmem:[%s210_s25] sm:$0xff]   ;;  %v881_v5 = vld [vmem:[%s210_s25 + $0x8] sm:$0xff]   ;;  %v882_v6 = vld [vmem:[%s210_s25 + $0x10] sm:$0xff]   ;;  %s228_s5 = scalar_lea.vmem %s1006_s3, %s709_s29 }
  0x12   : > { %829 = vmatprep.mubr.msk.bf16.mxu0 %vm306_vm1, %v880_v3  ;;  %v884_v7 = vld [vmem:[%s210_s25 + $0x20] sm:$0xff]   ;;  %v885_v8 = vld [vmem:[%s210_s25 + $0x28] sm:$0xff]   ;;  %v886_v9 = vld [vmem:[%s210_s25 + $0x30] sm:$0xff]  }
  0x13   : > { %837 = vmatprep.mubr.msk.bf16.mxu1 %vm306_vm1, %v884_v7  ;;  %830 = vmatmul.mubr.msk.bf16.vlgmr.msra.gmra.mrb[0].mxu0 %vm306_vm1, %v881_v5  ;;  %v883_v10 = vld [vmem:[%s210_s25 + $0x18] sm:$0xff]  }
  0x14   : > { %838 = vmatmul.mubr.msk.bf16.vlgmr.msra.gmra.mrb[0].mxu1 %vm306_vm1, %v885_v8  ;;  %833 = vmatprep.mubr.msk.bf16.mxu0 %vm306_vm1, %v882_v6  ;;  %v887_v11 = vld [vmem:[%s210_s25 + $0x38] sm:$0xff]  }
  0x15   : > { %841 = vmatprep.mubr.msk.bf16.mxu1 %vm306_vm1, %v886_v9 }
  0x1b   : > { %834 = vmatmul.mubr.msk.bf16.gmra.mrb[4].mxu0 %vm306_vm1, %v883_v10 }
  0x1c   : > { %842 = vmatmul.mubr.msk.bf16.gmra.mrb[4].mxu1 %vm306_vm1, %v887_v11 }
  0xe6   : > { %v831_v12 = vpop.f32.mrb[0].mxu0 }
  0xe7   : > { %v839_v13 = vpop.f32.mrb[0].mxu1  ;;  %v369_v14 = vpop.f32.mrb[1].mxu0  ;;  %v456_v27 = vmul.f32 %v831_v12, %v831_v12 }
  0xe8   : > { %v401_v15 = vpop.f32.mrb[1].mxu1  ;;  %v832_v16 = vpop.f32.mrb[2].mxu0  ;;  %v454_v22 = vmul.f32 %v369_v14, %v369_v14  ;;  %v464_v63 = vmul.f32 %v839_v13, %v839_v13 }
  0xe9   : > { %v840_v17 = vpop.f32.mrb[2].mxu1  ;;  %v773_v18 = vpack.c.bf16 %v832_v16, %v831_v12  ;;  %v372_v19 = vpop.f32.mrb[3].mxu0  ;;  %v457_v30 = vmul.f32 %v832_v16, %v832_v16  ;;  %v462_v57 = vmul.f32 %v401_v15, %v401_v15 }
  0xea   : > { %v793_v20 = vpack.c.bf16 %v840_v17, %v839_v13  ;;  %v404_v21 = vpop.f32.mrb[3].mxu1  ;;  %v432_v23 = vadd.f32 %v372_v19, %v369_v14  ;;  %v455_v24 = vmul.f32 %v372_v19, %v372_v19  ;;  %v768_v25 = vpack.c.bf16 %v372_v19, %v369_v14 }
  0xeb   : > { %805 = vst [vmem:[%s980_s28 + $0x8] sm:$0xff] %v773_v18   ;;  %v788_v26 = vpack.c.bf16 %v404_v21, %v401_v15  ;;  %v463_v62 = vmul.f32 %v404_v21, %v404_v21  ;;  %v465_v2 = vmul.f32 %v840_v17, %v840_v17 }
  0xec   : > { %809 = vst [vmem:[%s980_s28 + $0x28] sm:$0xff] %v793_v20   ;;  %v433_v28 = vadd.f32 %v831_v12, %v432_v23  ;;  %v470_v29 = vadd.f32 %v455_v24, %v454_v22  ;;  %769 = vst [vmem:[%s980_s28] sm:$0xff] %v768_v25  }
  0xed   : > { %808 = vst [vmem:[%s980_s28 + $0x20] sm:$0xff] %v788_v26  }
  0xee   : > { %v471_v31 = vadd.f32 %v470_v29, %v456_v27  ;;  %v835_v32 = vpop.f32.mrb[4].mxu0  ;;  %v434_v33 = vadd.f32 %v832_v16, %v433_v28 }
  0xef   : > { %v843_v34 = vpop.f32.mrb[4].mxu1  ;;  %v385_v35 = vpop.f32.mrb[5].mxu0  ;;  %v460_v51 = vmul.f32 %v835_v32, %v835_v32 }
  0xf0   : > { %v417_v36 = vpop.f32.mrb[5].mxu1  ;;  %v435_v37 = vadd.f32 %v434_v33, %v385_v35  ;;  %v458_v38 = vmul.f32 %v385_v35, %v385_v35  ;;  %v472_v39 = vadd.f32 %v471_v31, %v457_v30  ;;  %v836_v40 = vpop.f32.mrb[6].mxu0  ;;  %v468_v11 = vmul.f32 %v843_v34, %v843_v34 }
  0xf1   : > { %v844_v41 = vpop.f32.mrb[6].mxu1  ;;  %v783_v42 = vpack.c.bf16 %v836_v40, %v835_v32  ;;  %v388_v43 = vpop.f32.mrb[7].mxu0  ;;  %v461_v54 = vmul.f32 %v836_v40, %v836_v40  ;;  %v466_v5 = vmul.f32 %v417_v36, %v417_v36 }
  0xf2   : > { %v803_v44 = vpack.c.bf16 %v844_v41, %v843_v34  ;;  %v420_v45 = vpop.f32.mrb[7].mxu1  ;;  %v473_v46 = vadd.f32 %v472_v39, %v458_v38  ;;  %v436_v47 = vadd.f32 %v435_v37, %v388_v43  ;;  %v459_v48 = vmul.f32 %v388_v43, %v388_v43 }
  0xf3   : > { %v778_v49 = vpack.c.bf16 %v388_v43, %v385_v35  ;;  %807 = vst [vmem:[%s980_s28 + $0x18] sm:$0xff] %v783_v42   ;;  %v798_v50 = vpack.c.bf16 %v420_v45, %v417_v36  ;;  %v467_v10 = vmul.f32 %v420_v45, %v420_v45 }
  0xf4   : > { %811 = vst [vmem:[%s980_s28 + $0x38] sm:$0xff] %v803_v44   ;;  %v437_v52 = vadd.f32 %v835_v32, %v436_v47  ;;  %v474_v53 = vadd.f32 %v473_v46, %v459_v48 }
  0xf5   : > { %806 = vst [vmem:[%s980_s28 + $0x10] sm:$0xff] %v778_v49   ;;  %810 = vst [vmem:[%s980_s28 + $0x30] sm:$0xff] %v798_v50  }
  0xf6   : > { %v475_v55 = vadd.f32 %v474_v53, %v460_v51  ;;  %v438_v56 = vadd.f32 %v836_v40, %v437_v52 }
  0xf8   : > { %v439_v58 = vadd.f32 %v438_v56, %v401_v15  ;;  %v476_v59 = vadd.f32 %v475_v55, %v461_v54  ;;  %v469_v15 = vmul.f32 %v844_v41, %v844_v41 }
  0xfa   : > { %v477_v60 = vadd.f32 %v476_v59, %v462_v57  ;;  %v440_v61 = vadd.f32 %v439_v58, %v404_v21 }
  0xfc   : > { %v441_v0 = vadd.f32 %v839_v13, %v440_v61  ;;  %v478_v1 = vadd.f32 %v477_v60, %v463_v62 }
  0xfe   : > { %v479_v3 = vadd.f32 %v478_v1, %v464_v63  ;;  %v442_v4 = vadd.f32 %v840_v17, %v441_v0 }
 0x100   : > { %v443_v6 = vadd.f32 %v442_v4, %v417_v36  ;;  %v480_v7 = vadd.f32 %v479_v3, %v465_v2 }
 0x102   : > { %v481_v8 = vadd.f32 %v480_v7, %v466_v5  ;;  %v444_v9 = vadd.f32 %v443_v6, %v420_v45 }
 0x104   : > { %v445_v12 = vadd.f32 %v843_v34, %v444_v9  ;;  %v482_v14 = vadd.f32 %v481_v8, %v467_v10 }
 0x106   : > { %v446_v16 = vadd.f32 %v844_v41, %v445_v12  ;;  %v483_v18 = vadd.f32 %v482_v14, %v468_v11 }
 0x108   : > { %v447_v19 = vrot.slane %v446_v16, 4  ;;  %v484_v20 = vadd.f32 %v483_v18, %v469_v15 }
 0x10a   : > { %v448_v13 = vadd.f32 %v447_v19, %v446_v16  ;;  %v485_v21 = vrot.slane %v484_v20, 4 }
 0x10c   : > { %v449_v22 = vrot.slane %v448_v13, 2  ;;  %v486_v23 = vadd.f32 %v485_v21, %v484_v20 }
 0x10e   : > { %v450_v17 = vadd.f32 %v449_v22, %v448_v13  ;;  %v487_v24 = vrot.slane %v486_v23, 2 }
 0x110   : > { %v451_v25 = vrot.slane %v450_v17, 1  ;;  %v488_v26 = vadd.f32 %v487_v24, %v486_v23 }
 0x112   : > { %v452_v27 = vadd.f32 %v451_v25, %v450_v17  ;;  %v489_v28 = vrot.slane %v488_v26, 1 }
 0x114   : > { %453 = vst [vmem:[%s228_s5] sm:$0x1] %v452_v27  ;;  %v490_v29 = vadd.f32 %v489_v28, %v488_v26 }
 0x116   : > { %491 = vst [vmem:[%s228_s5 + $0x1] sm:$0x1] %v490_v29 }
 0x117 PF: > { %s14_s14 = sadd.s32 1, %s910_s14   ;;  %s1007_s12 = smov %s906_s13 }
 0x118   : > { %p11_p5 = scmp.ge.s32.totalorder %s14_s14, 4   ;;  %s1008_s13 = smov %s1010_s15 }
 0x11a   :  { %13 = sbr.rel (!%p11_p5) target bundleno = 2 (0x2), region = 70 }

// kernel: downsample.3
= control target key start
LH: loop header
LB: loop body
LE: loop exit
PB: predicated region body
PF: predicated region fallthrough
CT: control target
= control target key end

     0   :  { %s586_s12 = smov 0   ;;  %s588_s13 = smov 0   ;;  %s693_s0 = inlined_call_operand.vmem [shape: bf16[2,128,128], index: 0, kind: input, shape index: {}]   ;;  %s694_s1 = inlined_call_operand.vmem [shape: f32[1,128], index: 1, kind: input, shape index: {}]   ;;  %s695_s2 = inlined_call_operand.vmem [shape: f32[1,128], index: 2, kind: input, shape index: {}]   ;;  %s696_s3 = inlined_call_operand.vmem [shape: f32[2,128,128], index: 3, kind: output, shape index: {}]  }
   0x1   :  { %s590_s14 = smov 0  }
   0x2 LB: > { %s25_s15 = sadd.s32 1, %s560_s13  ;;  %p468_p0 = scmp.ge.s32.totalorder %s564_s14, 1  ;;  %s564_s14 = sphi %s590_s14, %s13_s14   ;;  %s560_s13 = sphi %s588_s13, %s698_s13   ;;  %s556_s12 = sphi %s586_s12, %s697_s12  }
   0x3   : > { %p27_p1 = scmp.ge.s32.totalorder %s25_s15, 2  ;;  %p158_p2 = scmp.lt.s32.totalorder %s564_s14, 3 }
   0x5   : > { %s700_s15 = smov (%p27_p1, %s25_s15), 0  ;;  %p159_p3 = pnand %p468_p0, %p158_p2 }
   0x6   : > { %p190_p4 = scmp.lt.s32.totalorder (!%p159_p3), %s556_s12, 1  ;;  %v616_v1 = vld [vmem:[%s694_s1] ss:$0 sm:$0xff] (!%p159_p3) }
   0x7   : > { %162 = sbr.rel (%p159_p3) target bundleno = 217 (0xd9), region = 32  ;;  %v622_v6 = vld [vmem:[%s695_s2] ss:$0 sm:$0xff] (!%p159_p3) }
   0xe   : > { %s702_s12 = smov (!%p190_p4, %s556_s12), 1 }
   0xf   : > { %s477_s16 = sshll.u32 %s702_s12, 6  ;;  %s478_s24 = sshll.u32 %s702_s12, 7 }
  0x10   : > { %s610_s19 = scalar_lea.vmem %s693_s0, %s477_s16  ;;  %s666_s27 = scalar_lea.vmem %s696_s3, %s478_s24 }
  0x11   : > { %v480_v0 = vld [vmem:[%s610_s19] sm:$0xff]   ;;  %v511_v2 = vld [vmem:[%s610_s19 + $0x8] sm:$0xff]   ;;  %v512_v11 = vld [vmem:[%s610_s19 + $0x10] sm:$0xff]  }
  0x12   : > { %v481_v3 = vunpack.c.l.bf16 %v480_v0  ;;  %v482_v4 = vunpack.c.h.bf16 %v480_v0  ;;  %v485_v5 = vunpack.c.l.bf16 %v511_v2  ;;  %v486_v7 = vunpack.c.h.bf16 %v511_v2  ;;  %v513_v25 = vld [vmem:[%s610_s19 + $0x18] sm:$0xff]   ;;  %v514_v36 = vld [vmem:[%s610_s19 + $0x20] sm:$0xff]   ;;  %v515_v47 = vld [vmem:[%s610_s19 + $0x28] sm:$0xff]  }
  0x13   : > { %v489_v15 = vunpack.c.l.bf16 %v512_v11  ;;  %v490_v20 = vunpack.c.h.bf16 %v512_v11  ;;  %v493_v26 = vunpack.c.l.bf16 %v513_v25  ;;  %v494_v31 = vunpack.c.h.bf16 %v513_v25  ;;  %v516_v58 = vld [vmem:[%s610_s19 + $0x30] sm:$0xff]  }
  0x14   : > { %v246_v8 = vmul.f32 %v481_v3, %v616_v1  ;;  %v247_v9 = vmul.f32 %v482_v4, %v616_v1  ;;  %v248_v10 = vmul.f32 %v485_v5, %v616_v1  ;;  %v249_v14 = vmul.f32 %v486_v7, %v616_v1  ;;  %v517_v7 = vld [vmem:[%s610_s19 + $0x38] sm:$0xff]  }
  0x15   : > { %v250_v24 = vmul.f32 %v489_v15, %v616_v1  ;;  %v251_v30 = vmul.f32 %v490_v20, %v616_v1  ;;  %v252_v35 = vmul.f32 %v493_v26, %v616_v1  ;;  %v253_v37 = vmul.f32 %v494_v31, %v616_v1 }
  0x16   : > { %v269_v12 = vadd.f32 %v622_v6, %v246_v8  ;;  %v270_v13 = vadd.f32 %v622_v6, %v247_v9  ;;  %v271_v18 = vadd.f32 %v622_v6, %v248_v10  ;;  %v272_v23 = vadd.f32 %v622_v6, %v249_v14 }
  0x17   : > { %v273_v29 = vadd.f32 %v622_v6, %v250_v24  ;;  %v274_v34 = vadd.f32 %v622_v6, %v251_v30  ;;  %v275_v40 = vadd.f32 %v622_v6, %v252_v35  ;;  %v497_v41 = vunpack.c.l.bf16 %v514_v36 }
  0x18   : > { %vm285_vm0 = vcmp.ge.f32.partialorder %v269_v12, 0.0  ;;  %v301_v16 = vmul.f32 0.01, %v269_v12  ;;  %v302_v17 = vmul.f32 0.01, %v270_v13  ;;  %vm286_vm1 = vcmp.ge.f32.partialorder %v270_v13, 0.0 }
  0x19   : > { %v303_v22 = vmul.f32 0.01, %v271_v18  ;;  %vm287_vm2 = vcmp.ge.f32.partialorder %v271_v18, 0.0  ;;  %v304_v28 = vmul.f32 0.01, %v272_v23  ;;  %vm288_vm3 = vcmp.ge.f32.partialorder %v272_v23, 0.0 }
  0x1a   : > { %v317_v19 = vsel %vm285_vm0, %v269_v12, %v301_v16  ;;  %v318_v21 = vsel %vm286_vm1, %v270_v13, %v302_v17  ;;  %v305_v33 = vmul.f32 0.01, %v273_v29  ;;  %vm289_vm4 = vcmp.ge.f32.partialorder %v273_v29, 0.0 }
  0x1b   : > { %333 = vxpose.xlu0.b32.start [1/16] %v317_v19, 128  ;;  %v319_v27 = vsel %vm287_vm2, %v271_v18, %v303_v22  ;;  %v320_v32 = vsel %vm288_vm3, %v272_v23, %v304_v28  ;;  %v306_v39 = vmul.f32 0.01, %v274_v34  ;;  %vm290_vm5 = vcmp.ge.f32.partialorder %v274_v34, 0.0 }
  0x1c   : > { %v321_v38 = vsel %vm289_vm4, %v273_v29, %v305_v33  ;;  %v276_v42 = vadd.f32 %v622_v6, %v253_v37  ;;  %v307_v44 = vmul.f32 0.01, %v275_v40  ;;  %v254_v45 = vmul.f32 %v497_v41, %v616_v1 }
  0x1d   : > { %v322_v43 = vsel %vm290_vm5, %v274_v34, %v306_v39  ;;  %v498_v46 = vunpack.c.h.bf16 %v514_v36  ;;  %vm291_vm6 = vcmp.ge.f32.partialorder %v275_v40, 0.0  ;;  %v501_v52 = vunpack.c.l.bf16 %v515_v47 }
  0x1e   : > { %v308_v48 = vmul.f32 0.01, %v276_v42  ;;  %v323_v49 = vsel %vm291_vm6, %v275_v40, %v307_v44  ;;  %v277_v50 = vadd.f32 %v622_v6, %v254_v45  ;;  %vm292_vm7 = vcmp.ge.f32.partialorder %v276_v42, 0.0 }
  0x1f   : > { %334 = vxpose.xlu0.b32.cont [2/16] %v318_v21, 128  ;;  %v255_v51 = vmul.f32 %v498_v46, %v616_v1  ;;  %v502_v53 = vunpack.c.h.bf16 %v515_v47  ;;  %v256_v57 = vmul.f32 %v501_v52, %v616_v1  ;;  %v505_v59 = vunpack.c.l.bf16 %v516_v58 }
  0x20   : > { %v324_v54 = vsel %vm292_vm7, %v276_v42, %v308_v48  ;;  %v309_v55 = vmul.f32 0.01, %v277_v50  ;;  %vm293_vm8 = vcmp.ge.f32.partialorder %v277_v50, 0.0  ;;  %v506_v0 = vunpack.c.h.bf16 %v516_v58 }
  0x21   : > { %v278_v56 = vadd.f32 %v622_v6, %v255_v51  ;;  %v279_v62 = vadd.f32 %v622_v6, %v256_v57  ;;  %v257_v63 = vmul.f32 %v502_v53, %v616_v1  ;;  %v258_v5 = vmul.f32 %v505_v59, %v616_v1 }
  0x22   : > { %v325_v60 = vsel %vm293_vm8, %v277_v50, %v309_v55  ;;  %v509_v8 = vunpack.c.l.bf16 %v517_v7  ;;  %v259_v12 = vmul.f32 %v506_v0, %v616_v1  ;;  %v510_v13 = vunpack.c.h.bf16 %v517_v7 }
  0x23   : > { %335 = vxpose.xlu0.b32.cont [3/16] %v319_v27, 128  ;;  %v310_v61 = vmul.f32 0.01, %v278_v56  ;;  %vm294_vm9 = vcmp.ge.f32.partialorder %v278_v56, 0.0  ;;  %v311_v3 = vmul.f32 0.01, %v279_v62  ;;  %v280_v4 = vadd.f32 %v622_v6, %v257_v63 }
  0x24   : > { %vm295_vm10 = vcmp.ge.f32.partialorder %v279_v62, 0.0  ;;  %v281_v11 = vadd.f32 %v622_v6, %v258_v5  ;;  %v282_v16 = vadd.f32 %v622_v6, %v259_v12  ;;  %v260_v17 = vmul.f32 %v509_v8, %v616_v1 }
  0x25   : > { %v326_v2 = vsel %vm294_vm9, %v278_v56, %v310_v61  ;;  %v327_v9 = vsel %vm295_vm10, %v279_v62, %v311_v3  ;;  %v312_v10 = vmul.f32 0.01, %v280_v4  ;;  %vm296_vm11 = vcmp.ge.f32.partialorder %v280_v4, 0.0 }
  0x26   : > { %v313_v15 = vmul.f32 0.01, %v281_v11  ;;  %vm297_vm12 = vcmp.ge.f32.partialorder %v281_v11, 0.0  ;;  %v314_v19 = vmul.f32 0.01, %v282_v16  ;;  %v283_v20 = vadd.f32 %v622_v6, %v260_v17 }
  0x27   : > { %336 = vxpose.xlu0.b32.cont [4/16] %v320_v32, 128  ;;  %v328_v14 = vsel %vm296_vm11, %v280_v4, %v312_v10  ;;  %v261_v21 = vmul.f32 %v510_v13, %v616_v1  ;;  %vm298_vm13 = vcmp.ge.f32.partialorder %v282_v16, 0.0 }
  0x28   : > { %v329_v18 = vsel %vm297_vm12, %v281_v11, %v313_v15  ;;  %v330_v22 = vsel %vm298_vm13, %v282_v16, %v314_v19  ;;  %v315_v23 = vmul.f32 0.01, %v283_v20  ;;  %vm299_vm14 = vcmp.ge.f32.partialorder %v283_v20, 0.0 }
  0x29   : > { %v284_v24 = vadd.f32 %v622_v6, %v261_v21 }
  0x2a   : > { %v331_v25 = vsel %vm299_vm14, %v283_v20, %v315_v23 }
  0x2b   : > { %337 = vxpose.xlu0.b32.cont [5/16] %v321_v38, 128  ;;  %v316_v26 = vmul.f32 0.01, %v284_v24  ;;  %vm300_vm15 = vcmp.ge.f32.partialorder %v284_v24, 0.0 }
  0x2d   : > { %v332_v27 = vsel %vm300_vm15, %v284_v24, %v316_v26 }
  0x2f   : > { %338 = vxpose.xlu0.b32.cont [6/16] %v322_v43, 128 }
  0x33   : > { %339 = vxpose.xlu0.b32.cont [7/16] %v323_v49, 128 }
  0x37   : > { %340 = vxpose.xlu0.b32.cont [8/16] %v324_v54, 128 }
  0x3b   : > { %341 = vxpose.xlu0.b32.cont [9/16] %v325_v60, 128 }
  0x3f   : > { %342 = vxpose.xlu0.b32.cont [10/16] %v326_v2, 128 }
  0x43   : > { %343 = vxpose.xlu0.b32.cont [11/16] %v327_v9, 128 }
  0x47   : > { %344 = vxpose.xlu0.b32.cont [12/16] %v328_v14, 128 }
  0x4b   : > { %345 = vxpose.xlu0.b32.cont [13/16] %v329_v18, 128 }
  0x4f   : > { %346 = vxpose.xlu0.b32.cont [14/16] %v330_v22, 128 }
  0x53   : > { %347 = vxpose.xlu0.b32.cont [15/16] %v331_v25, 128 }
  0x57   : > { %348 = vxpose.xlu0.b32.end [16/16] %v332_v27, 128 }
  0x9b   : > { %v349_v1 = vpop.trf.xlu0 }
  0x9c   : > { %365 = vst [vmem:[%s666_s27] sm:$0xff] %v349_v1 }
  0x9f   : > { %v350_v6 = vpop.trf.xlu0 }
  0xa0   : > { %366 = vst [vmem:[%s666_s27 + $0x8] sm:$0xff] %v350_v6 }
  0xa3   : > { %v351_v28 = vpop.trf.xlu0 }
  0xa4   : > { %367 = vst [vmem:[%s666_s27 + $0x10] sm:$0xff] %v351_v28 }
  0xa7   : > { %v352_v29 = vpop.trf.xlu0 }
  0xa8   : > { %368 = vst [vmem:[%s666_s27 + $0x18] sm:$0xff] %v352_v29 }
  0xab   : > { %v353_v30 = vpop.trf.xlu0 }
  0xac   : > { %369 = vst [vmem:[%s666_s27 + $0x20] sm:$0xff] %v353_v30 }
  0xaf   : > { %v354_v31 = vpop.trf.xlu0 }
  0xb0   : > { %370 = vst [vmem:[%s666_s27 + $0x28] sm:$0xff] %v354_v31 }
  0xb3   : > { %v355_v32 = vpop.trf.xlu0 }
  0xb4   : > { %371 = vst [vmem:[%s666_s27 + $0x30] sm:$0xff] %v355_v32 }
  0xb7   : > { %v356_v33 = vpop.trf.xlu0 }
  0xb8   : > { %372 = vst [vmem:[%s666_s27 + $0x38] sm:$0xff] %v356_v33 }
  0xbb   : > { %v357_v34 = vpop.trf.xlu0 }
  0xbc   : > { %373 = vst [vmem:[%s666_s27 + $0x40] sm:$0xff] %v357_v34 }
  0xbf   : > { %v358_v35 = vpop.trf.xlu0 }
  0xc0   : > { %374 = vst [vmem:[%s666_s27 + $0x48] sm:$0xff] %v358_v35 }
  0xc3   : > { %v359_v36 = vpop.trf.xlu0 }
  0xc4   : > { %375 = vst [vmem:[%s666_s27 + $0x50] sm:$0xff] %v359_v36 }
  0xc7   : > { %v360_v37 = vpop.trf.xlu0 }
  0xc8   : > { %376 = vst [vmem:[%s666_s27 + $0x58] sm:$0xff] %v360_v37 }
  0xcb   : > { %v361_v38 = vpop.trf.xlu0 }
  0xcc   : > { %377 = vst [vmem:[%s666_s27 + $0x60] sm:$0xff] %v361_v38 }
  0xcf   : > { %v362_v39 = vpop.trf.xlu0 }
  0xd0   : > { %378 = vst [vmem:[%s666_s27 + $0x68] sm:$0xff] %v362_v39 }
  0xd3   : > { %v363_v40 = vpop.trf.xlu0 }
  0xd4   : > { %379 = vst [vmem:[%s666_s27 + $0x70] sm:$0xff] %v363_v40 }
  0xd7   : > { %v364_v41 = vpop.trf.xlu0 }
  0xd8   : > { %380 = vst [vmem:[%s666_s27 + $0x78] sm:$0xff] %v364_v41 }
  0xd9 PF: > { %s13_s14 = sadd.s32 1, %s564_s14   ;;  %s697_s12 = smov %s560_s13 }
  0xda   : > { %p10_p5 = scmp.ge.s32.totalorder %s13_s14, 4   ;;  %s698_s13 = smov %s700_s15 }
  0xdc   :  { %12 = sbr.rel (!%p10_p5) target bundleno = 2 (0x2), region = 62 }

</bundles_post_ra>
